<compile_context>
chip_gen: v7x
topology: tpu7x:2x2x1
jax: 0.10.0
libtpu: 0.0.40
codegen_flags: <defaults>
</compile_context>

<pallas_src>
import functools

import jax
import jax.numpy as jnp
from jax.experimental import pallas as pl
from jax.experimental.pallas import tpu as pltpu


def _round_up(v, m):
    return ((v + m - 1) // m) * m


def _stats_kernel(x_ref, w1t_ref, b1_ref, w2t_ref, b2_ref,
                  sum_ref, sq_ref,
                  *, tm, tiles_per_group, n_valid, needs_mask, compute_dtype):
    """fc1 -> fc2 -> ReLU; accumulate per-channel sum / sum-of-squares.

    Grid: (row-group, tile-within-group).  Each row-group owns its own
    accumulator block, so there is no cross-core race when the leading
    "parallel" axis is sharded across TensorCores.
    """
    g = pl.program_id(0)
    i = pl.program_id(1)

    @pl.when(i == 0)
    def _():
        sum_ref[...] = jnp.zeros_like(sum_ref)
        sq_ref[...] = jnp.zeros_like(sq_ref)

    # fc_1 / fc_2 on the MXU with f32 accumulation; operands in compute_dtype.
    x = x_ref[...].astype(compute_dtype)
    h = jnp.dot(x, w1t_ref[...], preferred_element_type=jnp.float32) + b1_ref[...]
    y = jnp.dot(h.astype(w2t_ref.dtype), w2t_ref[...],
                preferred_element_type=jnp.float32) + b2_ref[...]
    y = jnp.maximum(y, 0.0)

    if not needs_mask:
        # N divides the tile grid exactly: no masking work anywhere.
        sum_ref[...] += jnp.sum(y, axis=0, keepdims=True)
        sq_ref[...] += jnp.sum(y * y, axis=0, keepdims=True)
    else:
        row0 = (g * tiles_per_group + i) * tm
        is_tail = row0 + tm > n_valid

        @pl.when(jnp.logical_not(is_tail))
        def _():
            sum_ref[...] += jnp.sum(y, axis=0, keepdims=True)
            sq_ref[...] += jnp.sum(y * y, axis=0, keepdims=True)

        @pl.when(is_tail)
        def _():
            # Only tiles straddling the N boundary pay the iota/select.
            rows = row0 + jax.lax.broadcasted_iota(jnp.int32, (tm, 1), 0)
            ym = jnp.where(rows < n_valid, y, 0.0)
            sum_ref[...] += jnp.sum(ym, axis=0, keepdims=True)
            sq_ref[...] += jnp.sum(ym * ym, axis=0, keepdims=True)


def _fused_bn_kernel(x_ref, w1t_ref, b1_ref, w2t_ref, b2_ref,
                     scale_ref, shift_ref, o_ref, *, compute_dtype):
    """Recompute fc1 -> fc2 -> ReLU and apply the collapsed BN affine (FMA)."""
    x = x_ref[...].astype(compute_dtype)
    h = jnp.dot(x, w1t_ref[...], preferred_element_type=jnp.float32) + b1_ref[...]
    y = jnp.dot(h.astype(w2t_ref.dtype), w2t_ref[...],
                preferred_element_type=jnp.float32) + b2_ref[...]
    y = jnp.maximum(y, 0.0)
    o_ref[...] = (y * scale_ref[...] + shift_ref[...]).astype(o_ref.dtype)


def fdense_relu_forward(x, w1, b1, w2, b2, gamma, beta, *,
                        eps=1e-5, tm=1024, compute_dtype=jnp.bfloat16):
    """x: (B, T, in_dim). Weights in PyTorch Linear layout: w1 (bottle, in_dim),
    w2 (out_dim, bottle). Returns (B, T, out_dim) in float32.

    compute_dtype: MXU operand dtype for x and the weight matrices
    (accumulation is always f32).  Defaults to bfloat16 for peak MXU
    throughput and halved weight DMA; pass jnp.float32 for full precision.
    """
    B, T, in_dim = x.shape
    bottle = w1.shape[0]
    out_dim = w2.shape[0]
    N = B * T

    cdt = jnp.dtype(compute_dtype)
    c_bpe = cdt.itemsize
    x_bpe = jnp.dtype(x.dtype).itemsize
    f32 = 4

    # ---- generation-aware VMEM budget ---------------------------------------
    try:
        cap = int(pltpu.get_tpu_info().vmem_capacity_bytes)
    except Exception:  # pragma: no cover - conservative fallback
        cap = 64 << 20
    # ~96 MiB on 128-MiB chips (v5e/v6e), ~48 MiB on v7x (64 MiB).
    budget = max(min(int(cap * 0.75), cap - (16 << 20)), 16 << 20)
    vmem_limit = max(min(cap - (12 << 20), budget + (8 << 20)), 24 << 20)

    def _vmem_estimate(tm_):
        per_row = (2 * in_dim * max(x_bpe, c_bpe)     # double-buffered x tile
                   + in_dim * c_bpe                   # in-kernel cast of x
                   + 3 * bottle * f32                 # h (+ cast copy, slack)
                   + 5 * out_dim * f32)               # y (+ mask copy, 2x out tile)
        fixed = (2 * (in_dim * bottle + bottle * out_dim) * c_bpe  # weights (2 bufs)
                 + (1 << 20))                                      # biases etc. + headroom
        return per_row * tm_ + fixed

    # ---- row tiling (as large as fits the budget) ----------------------------
    tm = max(8, min(_round_up(int(tm), 8), _round_up(N, 8)))
    while tm > 64 and _vmem_estimate(tm) > budget:
        tm = max(64, _round_up(tm // 2, 8))

    n_tiles = pl.cdiv(N, tm)
    num_groups = 2 if n_tiles >= 2 else 1    # leading "parallel" axis
    tiles_per_group = pl.cdiv(n_tiles, num_groups)
    rows_per_group = tiles_per_group * tm
    n_pad = num_groups * rows_per_group
    needs_mask = n_pad != N

    # ---- host-side packing ----------------------------------------------------
    # Weights are tiny; x is only copied when row padding is genuinely needed,
    # and the compute-dtype cast is fused into that pad (half-size copy).
    x2 = x.reshape(N, in_dim)
    if n_pad > N:
        x2 = jnp.pad(x2.astype(cdt), ((0, n_pad - N), (0, 0)))
    w1t = w1.T.astype(cdt)                              # (in_dim, bottle)
    w2t = w2.T.astype(cdt)                              # (bottle, out_dim)
    b1r = b1.astype(jnp.float32).reshape(1, bottle)
    b2r = b2.astype(jnp.float32).reshape(1, out_dim)

    # ---- pass 1: per-group channel sum / sumsq (no activation writeback) -----
    kern1 = functools.partial(
        _stats_kernel, tm=tm, tiles_per_group=tiles_per_group,
        n_valid=N, needs_mask=needs_mask, compute_dtype=cdt)

    csum, csq = pl.pallas_call(
        kern1,
        out_shape=(
            jax.ShapeDtypeStruct((num_groups, 1, out_dim), jnp.float32),
            jax.ShapeDtypeStruct((num_groups, 1, out_dim), jnp.float32),
        ),
        grid_spec=pltpu.PrefetchScalarGridSpec(
            num_scalar_prefetch=0,
            grid=(num_groups, tiles_per_group),
            in_specs=[
                pl.BlockSpec((tm, in_dim),
                             lambda g, i: (g * tiles_per_group + i, 0)),
                pl.BlockSpec((in_dim, bottle), lambda g, i: (0, 0)),
                pl.BlockSpec((1, bottle), lambda g, i: (0, 0)),
                pl.BlockSpec((bottle, out_dim), lambda g, i: (0, 0)),
                pl.BlockSpec((1, out_dim), lambda g, i: (0, 0)),
            ],
            out_specs=[
                pl.BlockSpec((None, 1, out_dim), lambda g, i: (g, 0, 0)),
                pl.BlockSpec((None, 1, out_dim), lambda g, i: (g, 0, 0)),
            ],
        ),
        compiler_params=pltpu.CompilerParams(
            dimension_semantics=("parallel", "arbitrary"),
            vmem_limit_bytes=int(vmem_limit)),
    )(x2, w1t, b1r, w2t, b2r)

    # ---- BN statistics -> collapsed scale/shift (tiny plain-JAX op) ----------
    # Welford-style combine of the per-group partials: reduces the
    # E[y^2]-E[y]^2 cancellation vs. a single global subtraction.
    counts = jnp.clip(N - jnp.arange(num_groups) * rows_per_group,
                      0, rows_per_group).astype(jnp.float32)[:, None, None]
    mean_g = csum / jnp.maximum(counts, 1.0)             # (G, 1, out)
    m2_g = csq - csum * mean_g                           # per-group sum (y-mean_g)^2
    mean = jnp.sum(csum, axis=0) / N                     # (1, out)
    m2 = jnp.sum(m2_g + counts * (mean_g - mean) ** 2, axis=0)
    var = jnp.maximum(m2 / N, 0.0)                       # biased (training BN)
    scale = gamma.astype(jnp.float32).reshape(1, out_dim) * jax.lax.rsqrt(var + eps)
    shift = beta.astype(jnp.float32).reshape(1, out_dim) - mean * scale

    # ---- pass 2: recompute fc1+fc2+ReLU and fuse the BN FMA ------------------
    total_tiles = n_pad // tm
    kern2 = functools.partial(_fused_bn_kernel, compute_dtype=cdt)
    out = pl.pallas_call(
        kern2,
        out_shape=jax.ShapeDtypeStruct((n_pad, out_dim), jnp.float32),
        grid_spec=pltpu.PrefetchScalarGridSpec(
            num_scalar_prefetch=0,
            grid=(total_tiles,),
            in_specs=[
                pl.BlockSpec((tm, in_dim), lambda i: (i, 0)),
                pl.BlockSpec((in_dim, bottle), lambda i: (0, 0)),
                pl.BlockSpec((1, bottle), lambda i: (0, 0)),
                pl.BlockSpec((bottle, out_dim), lambda i: (0, 0)),
                pl.BlockSpec((1, out_dim), lambda i: (0, 0)),
                pl.BlockSpec((1, out_dim), lambda i: (0, 0)),
                pl.BlockSpec((1, out_dim), lambda i: (0, 0)),
            ],
            out_specs=pl.BlockSpec((tm, out_dim), lambda i: (i, 0)),
        ),
        compiler_params=pltpu.CompilerParams(
            dimension_semantics=("parallel",),
            vmem_limit_bytes=int(vmem_limit)),
    )(x2, w1t, b1r, w2t, b2r, scale, shift)

    if n_pad > N:
        out = out[:N]
    return out.reshape(B, T, out_dim)


def reference_forward(x, w1, b1, w2, b2, gamma, beta, eps=1e-5,
                      compute_dtype=None):
    """Plain-JAX reference mirroring the PyTorch module (training-mode BN).

    compute_dtype mirrors the kernel's operand casting so the bf16 path can be
    checked against an identically-rounded reference.
    """
    B, T, in_dim = x.shape
    cdt = x.dtype if compute_dtype is None else jnp.dtype(compute_dtype)
    xf = x.reshape(B * T, in_dim).astype(cdt)
    h = jnp.dot(xf, w1.T.astype(cdt),
                preferred_element_type=jnp.float32) + b1.astype(jnp.float32)
    y = jnp.dot(h.astype(cdt), w2.T.astype(cdt),
                preferred_element_type=jnp.float32) + b2.astype(jnp.float32)
    y = jnp.maximum(y, 0.0)
    mean = y.mean(axis=0)
    var = y.var(axis=0)  # biased
    y = (y - mean) * jax.lax.rsqrt(var + eps) * gamma + beta
    return y.reshape(B, T, -1)


if __name__ == "__main__":
    def _init_params(key, in_dim, bottle_dim, out_dim):
        kw1, kb1, kw2, kb2 = jax.random.split(key, 4)
        lim1 = 1.0 / (in_dim ** 0.5)
        lim2 = 1.0 / (bottle_dim ** 0.5)
        w1 = jax.random.uniform(kw1, (bottle_dim, in_dim), minval=-lim1, maxval=lim1)
        b1 = jax.random.uniform(kb1, (bottle_dim,), minval=-lim1, maxval=lim1)
        w2 = jax.random.uniform(kw2, (out_dim, bottle_dim), minval=-lim2, maxval=lim2)
        b2 = jax.random.uniform(kb2, (out_dim,), minval=-lim2, maxval=lim2)
        gamma = jnp.ones((out_dim,), jnp.float32)   # BatchNorm1d default weight
        beta = jnp.zeros((out_dim,), jnp.float32)   # BatchNorm1d default bias
        return w1, b1, w2, b2, gamma, beta

    key = jax.random.PRNGKey(0)
    kp, kx1, kx2 = jax.random.split(key, 3)
    in_dim, bottle_dim, out_dim = 32, 16, 32
    w1, b1, w2, b2, gamma, beta = _init_params(kp, in_dim, bottle_dim, out_dim)

    # --- check 1: tiny shape, explicit f32 compute path, tight tolerance -----
    B, T = 2, 8
    x = jax.random.normal(kx1, (B, T, in_dim), dtype=jnp.float32)
    out = jax.block_until_ready(
        fdense_relu_forward(x, w1, b1, w2, b2, gamma, beta,
                            compute_dtype=jnp.float32))
    ref = reference_forward(x, w1, b1, w2, b2, gamma, beta,
                            compute_dtype=jnp.float32)
    assert out.shape == (B, T, out_dim)
    assert jnp.allclose(out, ref, atol=2e-4, rtol=2e-4), \
        float(jnp.max(jnp.abs(out - ref)))

    # --- check 2: ragged N (row padding + tail masking + 2 row-groups),
    #              default bf16 compute path vs. a bf16-cast reference --------
    B2, T2 = 3, 50          # N = 150: not a multiple of the 64-row tile
    x2 = jax.random.normal(kx2, (B2, T2, in_dim), dtype=jnp.float32)
    out2 = jax.block_until_ready(
        fdense_relu_forward(x2, w1, b1, w2, b2, gamma, beta, tm=64))
    ref2 = reference_forward(x2, w1, b1, w2, b2, gamma, beta,
                             compute_dtype=jnp.bfloat16)
    assert out2.shape == (B2, T2, out_dim)
    assert bool(jnp.all(jnp.isfinite(out2)))
    assert jnp.allclose(out2, ref2, atol=5e-3, rtol=5e-3), \
        float(jnp.max(jnp.abs(out2 - ref2)))

    print("KERNEL_OK")
</pallas_src>

<mosaic_0001>
module attributes {stable_mosaic.version = 11 : i64} {
  func.func @_stats_kernel(%arg0: i32, %arg1: i32, %arg2: memref<16x32xf32, #tpu.memory_space<vmem>>, %arg3: memref<32x16xf32, #tpu.memory_space<vmem>>, %arg4: memref<1x16xf32, #tpu.memory_space<vmem>>, %arg5: memref<16x32xf32, #tpu.memory_space<vmem>>, %arg6: memref<1x32xf32, #tpu.memory_space<vmem>>, %arg7: memref<1x1x32xf32, #tpu.memory_space<vmem>>, %arg8: memref<1x1x32xf32, #tpu.memory_space<vmem>>) attributes {dimension_semantics = [#tpu.dimension_semantics<parallel>, #tpu.dimension_semantics<arbitrary>], iteration_bounds = array<i64: 1, 1>, scalar_prefetch = 0 : i64, scratch_operands = 0 : i64, tpu.core_type = #tpu.core_type<tc>, window_params = [{transform_indices = @transform_0, window_bounds = array<i64: 16, 32>}, {pipeline_mode = #tpu.pipeline_mode<synchronous>, transform_indices = @transform_1, window_bounds = array<i64: 32, 16>}, {pipeline_mode = #tpu.pipeline_mode<synchronous>, transform_indices = @transform_2, window_bounds = array<i64: 1, 16>}, {pipeline_mode = #tpu.pipeline_mode<synchronous>, transform_indices = @transform_3, window_bounds = array<i64: 16, 32>}, {pipeline_mode = #tpu.pipeline_mode<synchronous>, transform_indices = @transform_4, window_bounds = array<i64: 1, 32>}, {transform_indices = @transform_5, window_bounds = array<i64: 1, 1, 32>}, {transform_indices = @transform_6, window_bounds = array<i64: 1, 1, 32>}]} {
    %c0_i32 = arith.constant 0 : i32
    %0 = arith.cmpi eq, %arg1, %c0_i32 : i32
    %1 = arith.extui %0 : i1 to i32
    %c0_i32_0 = arith.constant 0 : i32
    %2 = arith.cmpi ne, %1, %c0_i32_0 : i32
    scf.if %2 {
      %cst_26 = arith.constant 0.000000e+00 : f32
      %33 = vector.broadcast %cst_26 : f32 to vector<1x32xf32>
      %c0_27 = arith.constant 0 : index
      %c0_28 = arith.constant 0 : index
      %c0_29 = arith.constant 0 : index
      %34 = vector.load %arg7[%c0_27, %c0_28, %c0_29] : memref<1x1x32xf32, #tpu.memory_space<vmem>>, vector<1x1x32xf32>
      %35 = vector.shape_cast %34 : vector<1x1x32xf32> to vector<1x32xf32>
      %36 = vector.shape_cast %33 : vector<1x32xf32> to vector<1x1x32xf32>
      tpu.vector_store %arg7[%c0_27, %c0_28, %c0_29], %36 {strides = array<i32>} : memref<1x1x32xf32, #tpu.memory_space<vmem>>, vector<1x1x32xf32>,
      %cst_30 = arith.constant 0.000000e+00 : f32
      %37 = vector.broadcast %cst_30 : f32 to vector<1x32xf32>
      %c0_31 = arith.constant 0 : index
      %c0_32 = arith.constant 0 : index
      %c0_33 = arith.constant 0 : index
      %38 = vector.load %arg8[%c0_31, %c0_32, %c0_33] : memref<1x1x32xf32, #tpu.memory_space<vmem>>, vector<1x1x32xf32>
      %39 = vector.shape_cast %38 : vector<1x1x32xf32> to vector<1x32xf32>
      %40 = vector.shape_cast %37 : vector<1x32xf32> to vector<1x1x32xf32>
      tpu.vector_store %arg8[%c0_31, %c0_32, %c0_33], %40 {strides = array<i32>} : memref<1x1x32xf32, #tpu.memory_space<vmem>>, vector<1x1x32xf32>,
    } else {
    }
    %c0 = arith.constant 0 : index
    %c0_1 = arith.constant 0 : index
    %3 = vector.load %arg2[%c0, %c0_1] : memref<16x32xf32, #tpu.memory_space<vmem>>, vector<16x32xf32>
    %c0_2 = arith.constant 0 : index
    %c0_3 = arith.constant 0 : index
    %4 = vector.load %arg3[%c0_2, %c0_3] : memref<32x16xf32, #tpu.memory_space<vmem>>, vector<32x16xf32>
    %cst = arith.constant dense<0.000000e+00> : vector<16x16xf32>
    %5 = tpu.matmul %3, %4, %cst {dimension_numbers = #tpu.dot_dimension_numbers<[1], [0], [0], [1], [0, 0, 1, 1], [], []>} : vector<16x32xf32>, vector<32x16xf32>, vector<16x16xf32> -> vector<16x16xf32>
    %c0_4 = arith.constant 0 : index
    %c0_5 = arith.constant 0 : index
    %6 = vector.load %arg4[%c0_4, %c0_5] : memref<1x16xf32, #tpu.memory_space<vmem>>, vector<1x16xf32>
    %7 = vector.broadcast %6 : vector<1x16xf32> to vector<16x16xf32>
    %8 = arith.addf %5, %7 : vector<16x16xf32>
    %c0_6 = arith.constant 0 : index
    %c0_7 = arith.constant 0 : index
    %9 = vector.load %arg5[%c0_6, %c0_7] : memref<16x32xf32, #tpu.memory_space<vmem>>, vector<16x32xf32>
    %cst_8 = arith.constant dense<0.000000e+00> : vector<16x32xf32>
    %10 = tpu.matmul %8, %9, %cst_8 {dimension_numbers = #tpu.dot_dimension_numbers<[1], [0], [0], [1], [0, 0, 1, 1], [], []>} : vector<16x16xf32>, vector<16x32xf32>, vector<16x32xf32> -> vector<16x32xf32>
    %c0_9 = arith.constant 0 : index
    %c0_10 = arith.constant 0 : index
    %11 = vector.load %arg6[%c0_9, %c0_10] : memref<1x32xf32, #tpu.memory_space<vmem>>, vector<1x32xf32>
    %12 = vector.broadcast %11 : vector<1x32xf32> to vector<16x32xf32>
    %13 = arith.addf %10, %12 : vector<16x32xf32>
    %cst_11 = arith.constant 0.000000e+00 : f32
    %14 = vector.broadcast %cst_11 : f32 to vector<16x32xf32>
    %15 = arith.maximumf %13, %14 : vector<16x32xf32>
    %c0_12 = arith.constant 0 : index
    %c0_13 = arith.constant 0 : index
    %c0_14 = arith.constant 0 : index
    %16 = vector.load %arg7[%c0_12, %c0_13, %c0_14] : memref<1x1x32xf32, #tpu.memory_space<vmem>>, vector<1x1x32xf32>
    %17 = vector.shape_cast %16 : vector<1x1x32xf32> to vector<1x32xf32>
    %cst_15 = arith.constant dense<0.000000e+00> : vector<32xf32>
    %18 = vector.multi_reduction <add>, %15, %cst_15 [0] : vector<16x32xf32> to vector<32xf32>
    %19 = vector.shape_cast %18 : vector<32xf32> to vector<1x32xf32>
    %20 = arith.addf %17, %19 : vector<1x32xf32>
    %c0_16 = arith.constant 0 : index
    %c0_17 = arith.constant 0 : index
    %c0_18 = arith.constant 0 : index
    %21 = vector.load %arg7[%c0_16, %c0_17, %c0_18] : memref<1x1x32xf32, #tpu.memory_space<vmem>>, vector<1x1x32xf32>
    %22 = vector.shape_cast %21 : vector<1x1x32xf32> to vector<1x32xf32>
    %23 = vector.shape_cast %20 : vector<1x32xf32> to vector<1x1x32xf32>
    tpu.vector_store %arg7[%c0_16, %c0_17, %c0_18], %23 {strides = array<i32>} : memref<1x1x32xf32, #tpu.memory_space<vmem>>, vector<1x1x32xf32>,
    %c0_19 = arith.constant 0 : index
    %c0_20 = arith.constant 0 : index
    %c0_21 = arith.constant 0 : index
    %24 = vector.load %arg8[%c0_19, %c0_20, %c0_21] : memref<1x1x32xf32, #tpu.memory_space<vmem>>, vector<1x1x32xf32>
    %25 = vector.shape_cast %24 : vector<1x1x32xf32> to vector<1x32xf32>
    %26 = arith.mulf %15, %15 : vector<16x32xf32>
    %cst_22 = arith.constant dense<0.000000e+00> : vector<32xf32>
    %27 = vector.multi_reduction <add>, %26, %cst_22 [0] : vector<16x32xf32> to vector<32xf32>
    %28 = vector.shape_cast %27 : vector<32xf32> to vector<1x32xf32>
    %29 = arith.addf %25, %28 : vector<1x32xf32>
    %c0_23 = arith.constant 0 : index
    %c0_24 = arith.constant 0 : index
    %c0_25 = arith.constant 0 : index
    %30 = vector.load %arg8[%c0_23, %c0_24, %c0_25] : memref<1x1x32xf32, #tpu.memory_space<vmem>>, vector<1x1x32xf32>
    %31 = vector.shape_cast %30 : vector<1x1x32xf32> to vector<1x32xf32>
    %32 = vector.shape_cast %29 : vector<1x32xf32> to vector<1x1x32xf32>
    tpu.vector_store %arg8[%c0_23, %c0_24, %c0_25], %32 {strides = array<i32>} : memref<1x1x32xf32, #tpu.memory_space<vmem>>, vector<1x1x32xf32>,
    return
  }
  func.func @transform_0(%arg0: i32, %arg1: i32) -> (i32, i32) {
    %c1_i32 = arith.constant 1 : i32
    %0 = arith.muli %arg0, %c1_i32 : i32
    %1 = arith.addi %0, %arg1 : i32
    %c0_i32 = arith.constant 0 : i32
    %c0_i32_0 = arith.constant 0 : i32
    return %1, %c0_i32 : i32, i32
  }
  func.func @transform_1(%arg0: i32, %arg1: i32) -> (i32, i32) {
    %c0_i32 = arith.constant 0 : i32
    %c0_i32_0 = arith.constant 0 : i32
    %c0_i32_1 = arith.constant 0 : i32
    return %c0_i32, %c0_i32_0 : i32, i32
  }
  func.func @transform_2(%arg0: i32, %arg1: i32) -> (i32, i32) {
    %c0_i32 = arith.constant 0 : i32
    %c0_i32_0 = arith.constant 0 : i32
    %c0_i32_1 = arith.constant 0 : i32
    return %c0_i32, %c0_i32_0 : i32, i32
  }
  func.func @transform_3(%arg0: i32, %arg1: i32) -> (i32, i32) {
    %c0_i32 = arith.constant 0 : i32
    %c0_i32_0 = arith.constant 0 : i32
    %c0_i32_1 = arith.constant 0 : i32
    return %c0_i32, %c0_i32_0 : i32, i32
  }
  func.func @transform_4(%arg0: i32, %arg1: i32) -> (i32, i32) {
    %c0_i32 = arith.constant 0 : i32
    %c0_i32_0 = arith.constant 0 : i32
    %c0_i32_1 = arith.constant 0 : i32
    return %c0_i32, %c0_i32_0 : i32, i32
  }
  func.func @transform_5(%arg0: i32, %arg1: i32) -> (i32, i32, i32) {
    %c0_i32 = arith.constant 0 : i32
    %c0_i32_0 = arith.constant 0 : i32
    %c0_i32_1 = arith.constant 0 : i32
    return %arg0, %c0_i32, %c0_i32_0 : i32, i32, i32
  }
  func.func @transform_6(%arg0: i32, %arg1: i32) -> (i32, i32, i32) {
    %c0_i32 = arith.constant 0 : i32
    %c0_i32_0 = arith.constant 0 : i32
    %c0_i32_1 = arith.constant 0 : i32
    return %arg0, %c0_i32, %c0_i32_0 : i32, i32, i32
  }
}

</mosaic_0001>

<bundles_post_ra>
// kernel: tpu_custom_call.1
= control target key start
LH: loop header
LB: loop body
LE: loop exit
PB: predicated region body
PF: predicated region fallthrough
CT: control target
= control target key end

     0   :  { %12 = vsyncpa [#allocation3], 0  ;;  %vm66_vm0 = vcmask 261120   ;;  %s509_s0 = inlined_call_operand.vmem [shape: f32[16,32], index: 0, kind: input, shape index: {}]   ;;  %s510_s1 = inlined_call_operand.vmem [shape: f32[32,16], index: 1, kind: input, shape index: {}]   ;;  %s511_s2 = inlined_call_operand.vmem [shape: f32[1,16], index: 2, kind: input, shape index: {}]   ;;  %s512_s3 = inlined_call_operand.vmem [shape: f32[16,32], index: 3, kind: input, shape index: {}]   ;;  %s513_s4 = inlined_call_operand.vmem [shape: f32[1,32], index: 4, kind: input, shape index: {}]   ;;  %s514_s5 = inlined_call_operand.hbm [shape: f32[1,1,32], index: 5, kind: output, shape index: {0}]   ;;  %s515_s6 = inlined_call_operand.hbm [shape: f32[1,1,32], index: 6, kind: output, shape index: {1}]  }
   0x1   :  { %v55_v0 = vld [vmem:[%s510_s1] sm:$0xff]  ;;  %v56_v1 = vld [vmem:[%s510_s1 + $0x8] sm:$0xff]  ;;  %v57_v2 = vld [vmem:[%s510_s1 + $0x10] sm:$0xff] }
   0x2   :  { %v336_v3 = vpack.c.bf16 %v56_v1, %v55_v0  ;;  %v58_v4 = vld [vmem:[%s510_s1 + $0x18] sm:$0xff]  ;;  %v53_v5 = vld [vmem:[%s509_s0] sm:$0xff] }
   0x3   :  { %v340_v6 = vpack.c.bf16 %v58_v4, %v57_v2  ;;  %326 = vmatprep.mubr.msk.f32.mxu0 %vm66_vm0, %v53_v5 }
   0x4   :  { %13 = vsyncpa [#allocation5], 0  ;;  %337 = vmatprep.subr.bf16.mxu0 %v336_v3  ;;  %v54_v7 = vld [vmem:[%s509_s0 + $0x8] sm:$0xff]  ;;  %v148_v8 = vld [vmem:[%s512_s3] sm:$0xff]  ;;  %vm157_vm1 = vcmask 130048   ;;  %vm50_vm2 = vcmask 253952  }
   0x5   :  { %339 = vmatpush3.bf16.msra.mxu0 %v336_v3  ;;  %v149_v9 = vld [vmem:[%s512_s3 + $0x8] sm:$0xff]  ;;  %v302_v11 = vld [vmem:[%s511_s2] ss:$0 sm:$0xff]  ;;  %v399_v16 = vmov 0.0   ;;  %s400_s2 = smov [#allocation2]   ;;  %s401_s14 = smov [#allocation4]  }
   0x6   :  { %341 = vmatprep.subr.bf16.mxu0 %v340_v6  ;;  %v344_v10 = vpack.c.bf16 %v149_v9, %v148_v8  ;;  %51 = vst.msk [vmem:[#allocation2] sm:$0x1] %vm50_vm2, %v399_v16  ;;  %52 = vst.msk [vmem:[#allocation4] sm:$0x1] %vm50_vm2, %v399_v16  ;;  %v305_v17 = vld [vmem:[%s513_s4] ss:$0 sm:$0xff] }
   0x7   :  { %s274_s4 = sshll.u32 %s400_s2, 4  ;;  %s284_s15 = sshll.u32 %s401_s14, 4  ;;  %s275_s4 = int_to_ptr.vmem [resolvable:$true] %s274_s4  ;;  %s476_s15 = int_to_ptr.vmem [resolvable:$true] %s284_s15 }
   0x8   :  { %345 = vmatprep.subr.bf16.mxu1 %v344_v10  ;;  %s351_s16 = scalar_lea.vmem %s275_s4, 16  ;;  %s355_s17 = scalar_lea.vmem %s275_s4, 32 }
   0x9   :  { %343 = vmatpush3.bf16.msra.mxu0 %v340_v6  ;;  %347 = vmatpush3.bf16.msra.mxu1 %v344_v10  ;;  %p352_p0 = scmp.ne.s32.totalorder %s275_s4, %s351_s16  ;;  %p356_p1 = scmp.lt.s32.totalorder %s275_s4, %s275_s4 }
   0xa   :  { %p357_p2 = scmp.lt.s32.totalorder %s355_s17, %s351_s16 }
   0xc   :  { %327 = vmatmul.mubr.msk.f32.vlgmr.msra.gmra.mrb[0].mxu0 %vm66_vm0, %v54_v7  ;;  %p358_p3 = por %p357_p2, %p356_p1 }
   0xd   :  { %v241_v41 = vld [vmem:[#allocation2] sm:$0x1]  ;;  %v254_v44 = vld [vmem:[#allocation4] sm:$0x1] }
   0xe   :  { %p359_p4 = pnand %p358_p3, %p352_p0 }
  0xdf   :  { %v328_v12 = vpop.f32.mrb[0].mxu0 }
  0xe0   :  { %v139_v13 = vpop.f32.mrb[1].mxu0  ;;  %v145_v15 = vadd.f32 %v328_v12, %v302_v11 }
  0xe1   :  { %v140_v14 = vadd.f32 %v302_v11, %v139_v13 }
  0xe3   :  { %333 = vmatprep.mubr.msk.f32.mxu1 %vm157_vm1, %v140_v14 }
  0xe4   :  { %334 = vmatmul.mubr.msk.f32.vlgmr.msra.gmra.mrb[0].mxu1 %vm157_vm1, %v145_v15 }
 0x1b7   :  { %v335_v18 = vpop.f32.mrb[0].mxu1 }
 0x1b8   :  { %v236_v19 = vadd.f32 %v335_v18, %v305_v17  ;;  %v230_v20 = vpop.f32.mrb[1].mxu1 }
 0x1b9   :  { %v231_v21 = vadd.f32 %v305_v17, %v230_v20 }
 0x1ba   :  { %v240_v22 = vmax.f32 %v236_v19, 0.0 }
 0x1bb   :  { %v239_v23 = vmax.f32 %v231_v21, 0.0 }
 0x1bc   :  { %v243_v24 = vsel %vm66_vm0, %v240_v22, 0.0  ;;  %v256_v25 = vmul.f32 %v240_v22, %v240_v22 }
 0x1bd   :  { %v242_v26 = vsel %vm66_vm0, %v239_v23, 0.0  ;;  %v255_v27 = vmul.f32 %v239_v23, %v239_v23 }
 0x1be   :  { %v258_v28 = vsel %vm66_vm0, %v256_v25, 0.0  ;;  %v244_v29 = vadd.f32 %v243_v24, %v242_v26 }
 0x1bf   :  { %v257_v30 = vsel %vm66_vm0, %v255_v27, 0.0 }
 0x1c0   :  { %v245_v31 = vrot.slane %v244_v29, 4  ;;  %v259_v32 = vadd.f32 %v258_v28, %v257_v30 }
 0x1c2   :  { %v246_v33 = vadd.f32 %v245_v31, %v244_v29  ;;  %v260_v34 = vrot.slane %v259_v32, 4 }
 0x1c4   :  { %v247_v35 = vrot.slane %v246_v33, 2  ;;  %v261_v36 = vadd.f32 %v260_v34, %v259_v32 }
 0x1c6   :  { %v248_v37 = vadd.f32 %v247_v35, %v246_v33  ;;  %v262_v38 = vrot.slane %v261_v36, 2 }
 0x1c8   :  { %v263_v39 = vadd.f32 %v262_v38, %v261_v36  ;;  %v249_v40 = vrot.slane %v248_v37, 1 }
 0x1ca   :  { %v250_v42 = vadd.f32 %v249_v40, %v248_v37  ;;  %v264_v43 = vrot.slane %v263_v39, 1 }
 0x1cc   :  { %v251_v45 = vadd.f32 %v250_v42, %v241_v41  ;;  %v265_v46 = vadd.f32 %v264_v43, %v263_v39 }
 0x1ce   :  { %253 = vst.msk [vmem:[#allocation2] sm:$0x1] %vm50_vm2, %v251_v45  ;;  %v266_v47 = vadd.f32 %v265_v46, %v254_v44 }
 0x1cf   :  { %362 = shalt.err (!%p359_p4)
}
 0x1d0   :  { %s363_s20 = scalar_lea.hbm %s514_s5, 16 }
 0x1d1   :  { %p364_p5 = scmp.ne.s32.totalorder %s514_s5, %s363_s20  ;;  %p367_p6 = scmp.lt.u32.totalorder %s363_s20, %s514_s5 }
 0x1d3   :  { %p369_p7 = pnand %p367_p6, %p364_p5 }
 0x1d5   :  { %372 = shalt.err (!%p369_p7)
}
 0x1d6   :  { %277 = dma.vmem_to_hbm [thread:$0]  %s275_s4, 16, %s514_s5, [#allocation3]   ;;  %267 = vst.msk [vmem:[#allocation4] sm:$0x1] %vm50_vm2, %v266_v47 }
 0x1d7   :  { %s373_s27 = scalar_lea.vmem %s476_s15, 16  ;;  %s377_s28 = scalar_lea.vmem %s476_s15, 32 }
 0x1d8   :  { %p374_p8 = scmp.ne.s32.totalorder %s476_s15, %s373_s27  ;;  %p378_p9 = scmp.lt.s32.totalorder %s476_s15, %s476_s15 }
 0x1d9   :  { %p379_p10 = scmp.lt.s32.totalorder %s377_s28, %s373_s27 }
 0x1db   :  { %p380_p11 = por %p379_p10, %p378_p9 }
 0x1dd   :  { %p381_p12 = pnand %p380_p11, %p374_p8 }
 0x1df   :  { %384 = shalt.err (!%p381_p12)
}
 0x1e0   :  { %s385_s7 = scalar_lea.hbm %s515_s6, 16 }
 0x1e1   :  { %p386_p13 = scmp.ne.s32.totalorder %s515_s6, %s385_s7  ;;  %p389_p0 = scmp.lt.u32.totalorder %s385_s7, %s515_s6 }
 0x1e3   :  { %p391_p1 = pnand %p389_p0, %p386_p13 }
 0x1e5   :  { %394 = shalt.err (!%p391_p1)
}
 0x1e6   :  { %287 = dma.vmem_to_hbm [thread:$0]  %s476_s15, 16, %s515_s6, [#allocation5]  }
 0x1e7   :  { %395 = dma.done.wait [#allocation3], 16  }
 0x1e8   :  { %396 = vsyncadd [#allocation3], 4294967280 }
 0x1e9   :  { %397 = dma.done.wait [#allocation5], 16  }
 0x1ea   :  { %398 = vsyncadd [#allocation5], 4294967280 }
 0x1eb   :  { %294 = vsyncpa [#allocation3], 1 }
 0x1ec   :  { %295 = vsyncpa [#allocation5], 1 }

</bundles_post_ra>
